<compile_context>
chip_gen: v7x
topology: tpu7x:2x2x1
jax: 0.10.0
libtpu: 0.0.40
codegen_flags: <defaults>
</compile_context>

<pallas_src>
import functools

import jax
import jax.numpy as jnp
from jax import lax
from jax.experimental import pallas as pl
from jax.experimental.pallas import tpu as pltpu


def _backbone_update_kernel(s_ref, w_ref, b_ref, o_ref):
    # s_ref: (tile_m, C_s)   VMEM row tile of s
    # w_ref: (c_bb,  C_s)    full weight, PyTorch layout, grid-invariant
    # b_ref: (c_bb,  1)      bias column, grid-invariant
    # o_ref: (c_bb,  tile_m) lane-dense transposed output tile
    acc = lax.dot_general(
        w_ref[...], s_ref[...],
        dimension_numbers=(((1,), (1,)), ((), ())),   # W @ s^T  (NT matmul)
        preferred_element_type=jnp.float32,
    )
    o_ref[...] = (acc + b_ref[...]).astype(o_ref.dtype)


def _round_down(x, k):
    return (x // k) * k


def _auto_tile_m(m, c_s, itemsize):
    """Pick a row tile: big enough to amortize per-step overhead, small enough
    for the lane-padded double-buffered VMEM footprint and v7x megacore split."""
    if m <= 1024:
        return m                                    # single block; block == array dims
    padded_cs = ((c_s + 127) // 128) * 128          # VMEM lane padding
    # ~10 MiB budget for the double-buffered, lane-padded s tile.
    vmem_cap = (10 * 1024 * 1024) // (2 * padded_cs * itemsize)
    # Keep >= ~8 grid steps so the 'parallel' axis can split across 2 TCs (v7x).
    split_cap = -(-m // 8)
    tile = max(1024, min(vmem_cap, split_cap))
    tile = max(128, _round_down(tile, 128))         # lane multiple (transposed out)
    return min(tile, m)


@functools.partial(jax.jit, static_argnames=("tile_m", "transposed_out"))
def backbone_update(s, weight, bias, tile_m=None, transposed_out=False):
    """
    Args:
        s:       [*, N_res, C_s] single representation
        weight:  [c_bb, C_s]  (PyTorch nn.Linear layout)
        bias:    [c_bb]
        tile_m:  optional row-tile override (rounded to a multiple of 128 when
                 tiling; None -> auto selection).
        transposed_out: if True, return the lane-dense [c_bb, M] result
                 (preferred when the consumer is fused / layout-agnostic).
    Returns:
        [*, N_res, c_bb] update vector (or [c_bb, M] if transposed_out).
    """
    *lead, c_s = s.shape
    c_bb = weight.shape[0]

    m = 1
    for d in lead:
        m *= d

    if m == 0:
        if transposed_out:
            return jnp.zeros((c_bb, 0), dtype=s.dtype)
        return jnp.zeros((*lead, c_bb), dtype=s.dtype)

    s2d = s.reshape(m, c_s)
    w2d = weight.astype(s.dtype)                       # [c_bb, C_s]
    b2d = bias.astype(jnp.float32).reshape(c_bb, 1)    # [c_bb, 1]

    itemsize = jnp.dtype(s.dtype).itemsize
    if tile_m is None:
        tm = _auto_tile_m(m, c_s, itemsize)
    else:
        tm = min(int(tile_m), m)
        if tm < m:
            tm = max(128, _round_down(tm, 128))        # lane-multiple when tiled
    grid_m = -(-m // tm)

    out_t = pl.pallas_call(
        _backbone_update_kernel,
        out_shape=jax.ShapeDtypeStruct((c_bb, m), s.dtype),
        grid_spec=pltpu.PrefetchScalarGridSpec(
            num_scalar_prefetch=0,
            grid=(grid_m,),
            in_specs=[
                pl.BlockSpec((tm, c_s), lambda i: (i, 0)),    # row tile of s
                pl.BlockSpec((c_bb, c_s), lambda i: (0, 0)),  # full W (grid-invariant)
                pl.BlockSpec((c_bb, 1), lambda i: (0, 0)),    # bias column (grid-invariant)
            ],
            out_specs=pl.BlockSpec((c_bb, tm), lambda i: (0, i)),  # lane-dense
        ),
        # 'parallel' lets the runtime shard the row axis across TensorCores
        # (v7x megacore); no-op on single-TC v5e/v6e.
        compiler_params=pltpu.CompilerParams(
            dimension_semantics=("parallel",),
        ),
    )(s2d, w2d, b2d)

    if transposed_out:
        return out_t                                   # [c_bb, M] lane-dense
    return out_t.T.reshape(*lead, c_bb)                # module semantics


if __name__ == "__main__":
    # Small shapes consistent with the module: batch=2, N_res=8, c_s=32, c_bb=6
    batch, n_res, c_s, c_bb = 2, 8, 32, 6

    key = jax.random.PRNGKey(0)
    k_s, k_w, k_b = jax.random.split(key, 3)

    s = jax.random.normal(k_s, (batch, n_res, c_s), dtype=jnp.float32)
    weight = jax.random.normal(k_w, (c_bb, c_s), dtype=jnp.float32) * 0.02
    bias = jax.random.normal(k_b, (c_bb,), dtype=jnp.float32) * 0.02

    # Case 1: tiny M -> single full-M block, grid = 1.
    update = jax.block_until_ready(backbone_update(s, weight, bias))
    ref = s @ weight.T + bias
    assert update.shape == (batch, n_res, c_bb), update.shape
    assert jnp.allclose(update, ref, atol=1e-5, rtol=1e-5), "mismatch (small M)"

    # Case 2: ragged multi-block path (M = 300, tile = 128, grid = 3; the
    # last blocks of both the s rows and the lane-dense output are masked).
    k_s2 = jax.random.fold_in(k_s, 1)
    s_big = jax.random.normal(k_s2, (3, 100, c_s), dtype=jnp.float32)
    update_big = jax.block_until_ready(backbone_update(s_big, weight, bias, tile_m=128))
    ref_big = s_big @ weight.T + bias
    assert update_big.shape == (3, 100, c_bb), update_big.shape
    assert jnp.allclose(update_big, ref_big, atol=1e-5, rtol=1e-5), "mismatch (ragged M)"

    # Case 3: auto tile selection with grid > 1 and the lane-dense transposed
    # output layout (M = 2400 -> tm = 1024, grid = 3, ragged last block).
    k_s3 = jax.random.fold_in(k_s, 2)
    s_med = jax.random.normal(k_s3, (4, 600, c_s), dtype=jnp.float32)
    upd_t = jax.block_until_ready(backbone_update(s_med, weight, bias, transposed_out=True))
    ref_med = (s_med.reshape(-1, c_s) @ weight.T + bias).T
    assert upd_t.shape == (c_bb, 4 * 600), upd_t.shape
    assert jnp.allclose(upd_t, ref_med, atol=1e-5, rtol=1e-5), "mismatch (auto tile)"

    print("KERNEL_OK")
</pallas_src>

<mosaic_0001>
module attributes {stable_mosaic.version = 11 : i64} {
  func.func @_backbone_update_kernel(%arg0: i32, %arg1: memref<16x32xf32, #tpu.memory_space<vmem>>, %arg2: memref<6x32xf32, #tpu.memory_space<vmem>>, %arg3: memref<6x1xf32, #tpu.memory_space<vmem>>, %arg4: memref<6x16xf32, #tpu.memory_space<vmem>>) attributes {dimension_semantics = [#tpu.dimension_semantics<parallel>], iteration_bounds = array<i64: 1>, scalar_prefetch = 0 : i64, scratch_operands = 0 : i64, tpu.core_type = #tpu.core_type<tc>, window_params = [{transform_indices = @transform_0, window_bounds = array<i64: 16, 32>}, {pipeline_mode = #tpu.pipeline_mode<synchronous>, transform_indices = @transform_1, window_bounds = array<i64: 6, 32>}, {pipeline_mode = #tpu.pipeline_mode<synchronous>, transform_indices = @transform_2, window_bounds = array<i64: 6, 1>}, {transform_indices = @transform_3, window_bounds = array<i64: 6, 16>}]} {
    %c0 = arith.constant 0 : index
    %c0_0 = arith.constant 0 : index
    %0 = vector.load %arg2[%c0, %c0_0] : memref<6x32xf32, #tpu.memory_space<vmem>>, vector<6x32xf32>
    %c0_1 = arith.constant 0 : index
    %c0_2 = arith.constant 0 : index
    %1 = vector.load %arg1[%c0_1, %c0_2] : memref<16x32xf32, #tpu.memory_space<vmem>>, vector<16x32xf32>
    %cst = arith.constant dense<0.000000e+00> : vector<6x16xf32>
    %2 = tpu.matmul %0, %1, %cst {dimension_numbers = #tpu.dot_dimension_numbers<[1], [1], [0], [0], [0, 0, 1, 0], [], []>} : vector<6x32xf32>, vector<16x32xf32>, vector<6x16xf32> -> vector<6x16xf32>
    %c0_3 = arith.constant 0 : index
    %c0_4 = arith.constant 0 : index
    %3 = vector.load %arg3[%c0_3, %c0_4] : memref<6x1xf32, #tpu.memory_space<vmem>>, vector<6x1xf32>
    %4 = vector.broadcast %3 : vector<6x1xf32> to vector<6x16xf32>
    %5 = arith.addf %2, %4 : vector<6x16xf32>
    %c0_5 = arith.constant 0 : index
    %c0_6 = arith.constant 0 : index
    %6 = vector.load %arg4[%c0_5, %c0_6] : memref<6x16xf32, #tpu.memory_space<vmem>>, vector<6x16xf32>
    tpu.vector_store %arg4[%c0_5, %c0_6], %5 {strides = array<i32>} : memref<6x16xf32, #tpu.memory_space<vmem>>, vector<6x16xf32>,
    return
  }
  func.func @transform_0(%arg0: i32) -> (i32, i32) {
    %c0_i32 = arith.constant 0 : i32
    %c0_i32_0 = arith.constant 0 : i32
    return %arg0, %c0_i32 : i32, i32
  }
  func.func @transform_1(%arg0: i32) -> (i32, i32) {
    %c0_i32 = arith.constant 0 : i32
    %c0_i32_0 = arith.constant 0 : i32
    %c0_i32_1 = arith.constant 0 : i32
    return %c0_i32, %c0_i32_0 : i32, i32
  }
  func.func @transform_2(%arg0: i32) -> (i32, i32) {
    %c0_i32 = arith.constant 0 : i32
    %c0_i32_0 = arith.constant 0 : i32
    %c0_i32_1 = arith.constant 0 : i32
    return %c0_i32, %c0_i32_0 : i32, i32
  }
  func.func @transform_3(%arg0: i32) -> (i32, i32) {
    %c0_i32 = arith.constant 0 : i32
    %c0_i32_0 = arith.constant 0 : i32
    return %c0_i32, %arg0 : i32, i32
  }
}

</mosaic_0001>

<bundles_post_ra>
// kernel: backbone_update.1
= control target key start
LH: loop header
LB: loop body
LE: loop exit
PB: predicated region body
PF: predicated region fallthrough
CT: control target
= control target key end

     0   :  { %8 = vsyncpa [#allocation3], 0  ;;  %s169_s12 = smov [#allocation2]   ;;  %s218_s0 = inlined_call_operand.vmem [shape: f32[16,32], index: 0, kind: input, shape index: {}]   ;;  %s219_s1 = inlined_call_operand.hbm [shape: f32[6,32], index: 1, kind: input, shape index: {}]   ;;  %s220_s2 = inlined_call_operand.vmem [shape: f32[6,1], index: 2, kind: input, shape index: {}]   ;;  %s221_s3 = inlined_call_operand.vmem [shape: f32[6,16], index: 3, kind: output, shape index: {}]  }
   0x1   :  { %s17_s13 = sshll.u32 %s169_s12, 4  ;;  %s145_s16 = scalar_lea.hbm %s219_s1, 128  ;;  %s18_s13 = int_to_ptr.vmem [resolvable:$true] %s17_s13 }
   0x2   :  { %p146_p0 = scmp.ne.s32.totalorder %s219_s1, %s145_s16  ;;  %p149_p1 = scmp.lt.u32.totalorder %s145_s16, %s219_s1 }
   0x4   :  { %p151_p2 = pnand %p149_p1, %p146_p0 }
   0x6   :  { %154 = shalt.err (!%p151_p2)
}
   0x7   :  { %s155_s21 = scalar_lea.vmem %s18_s13, 128  ;;  %p160_p4 = scmp.lt.s32.totalorder %s18_s13, %s18_s13 }
   0x8   :  { %p156_p3 = scmp.ne.s32.totalorder %s18_s13, %s155_s21  ;;  %p161_p5 = scmp.lt.s32.totalorder %s155_s21, %s155_s21 }
   0xa   :  { %p162_p6 = por %p161_p5, %p160_p4 }
   0xc   :  { %p163_p7 = pnand %p162_p6, %p156_p3 }
   0xe   :  { %166 = shalt.err (!%p163_p7)
}
   0xf   :  { %20 = dma.hbm_to_vmem [thread:$0]  %s219_s1, 128, %s18_s13, [#allocation3]  }
  0x10   :  { %167 = dma.done.wait [#allocation3], 128  }
  0x11   :  { %168 = vsyncadd [#allocation3], 4294967168  ;;  %v170_v0 = vmov 0.0|0.0   ;;  %vm171_vm0 = vmmov 0   ;;  %v172_v1 = vmov 0.0   ;;  %v173_v2 = vmov 0  }
  0x12   :  { %135 = vmatprep.subr.bf16.mxu0 %v170_v0  ;;  %132 = vmatprep.mubr.msk.f32.mxu0 %vm171_vm0, %v172_v1  ;;  %vm35_vm1 = vcmask 261120   ;;  %v27_v3 = vld [vmem:[%s218_s0] sm:$0xff]  ;;  %v28_v4 = vld [vmem:[%s218_s0 + $0x8] sm:$0xff]  ;;  %vm115_vm3 = vcmask 128000  }
  0x13   :  { %144 = vset.pattern.permute.xlu0 %v173_v2  ;;  %vm137_vm2 = vmpackc.low %vm35_vm1, %vm35_vm1  ;;  %v136_v5 = vpack.c.bf16 %v28_v4, %v27_v3  ;;  %v29_v6 = vld [vmem:[%s220_s2] sm:$0x3f] }
  0x14   :  { %32 = vperm.xlu0 %144, %v29_v6   ;;  %v26_v7 = vld [vmem:[#allocation2] sm:$0x3f] }
  0x15   :  { %138 = vmatpush3.bf16.xpose.msk.msra.mxu0 %vm137_vm2, %v136_v5 }
  0x1c   :  { %133 = vmatmul.mubr.msk.f32.vlgmr.msra.gmra.mrb[0].mxu0 %vm35_vm1, %v26_v7 }
  0x93   :  { %v33_v8 = vpop.permute.xlu0 %32 }
  0xef   :  { %v111_v9 = vpop.f32.mrb[0].mxu0 }
  0xf0   :  { %v112_v10 = vadd.f32 %v111_v9, %v33_v8  ;;  %v134_v11 = vpop.f32.mrb[1].mxu0 }
  0xf2   :  { %116 = vst.msk [vmem:[%s221_s3] sm:$0x3f] %vm115_vm3, %v112_v10 }
  0xf3   :  { %121 = vsyncpa [#allocation3], 1 }

</bundles_post_ra>
